<compile_context>
chip_gen: v5e
topology: v5e:2x2
jax: 0.10.0
libtpu: 0.0.40
codegen_flags: <defaults>
</compile_context>

<pallas_src>
import numpy as np
import jax
import jax.numpy as jnp
from jax.experimental import pallas as pl
from jax.experimental.pallas import tpu as pltpu

SELF_DIM = 36
AGENT_DIM = 28


def _dot_scale_att_kernel(x_ref, wq_rep_ref, wk_ref, wv_ref,
                          rdc_ref, bcast_ref, gth_ref,
                          wo_att_ref, wo_q_ref, bo_ref,
                          out_ref, att_ref):
    """One batch-tile of the full forward pass (everything in VMEM)."""
    hidden = wo_att_ref.shape[0]

    x = x_ref[...]                                                # [TB, D]

    # One MXU matmul each: replicated query, scaled keys, values (all agents).
    q_rep = jnp.dot(x, wq_rep_ref[...],
                    preferred_element_type=jnp.float32)           # [TB, A*H]
    k = jnp.dot(x, wk_ref[...], preferred_element_type=jnp.float32)   # [TB, A*H]
    v = jnp.dot(x, wv_ref[...], preferred_element_type=jnp.float32)   # [TB, A*H]

    # scores[b, a] = sum_h q[b, h] * k_a[b, h]   (1/sqrt(H) folded into wk)
    scores = jnp.dot(q_rep * k, rdc_ref[...],
                     preferred_element_type=jnp.float32)          # [TB, A]

    # softmax over the agent axis (lanes)
    m = jnp.max(scores, axis=-1, keepdims=True)
    e = jnp.exp(scores - m)
    att = e / jnp.sum(e, axis=-1, keepdims=True)                  # [TB, A]
    att_ref[...] = att

    # att_out[b, h] = sum_a att[b, a] * v_a[b, h]  (vectorized over agents)
    att_rep = jnp.dot(att, bcast_ref[...],
                      preferred_element_type=jnp.float32)         # [TB, A*H]
    att_out = jnp.dot(att_rep * v, gth_ref[...],
                      preferred_element_type=jnp.float32)         # [TB, H]

    q = q_rep[:, :hidden]                                         # [TB, H]

    # output head without a lane-axis concatenate
    out_ref[...] = (jnp.dot(att_out, wo_att_ref[...],
                            preferred_element_type=jnp.float32)
                    + jnp.dot(q, wo_q_ref[...],
                              preferred_element_type=jnp.float32)
                    + bo_ref[...])                                # bo is [1, O]


def _structured_weights(params, *, agent_num, hidden_dim, output_dim):
    """Fold the per-agent structure + 1/sqrt(H) scale into the weights."""
    a, h = agent_num, hidden_dim
    wq, wk, wv, wo, bo = (params["wq"], params["wk"], params["wv"],
                          params["wo"], params["bo"])
    inv_sqrt_h = jnp.float32(1.0 / np.sqrt(float(h)))

    # query replicated across the A agent lane-blocks (acts on full x).
    wq_rep = jnp.concatenate(
        [jnp.tile(wq, (1, a)),
         jnp.zeros((AGENT_DIM * a, a * h), jnp.float32)], axis=0)   # [D, A*H]

    def per_agent_block(w):
        blk = jax.scipy.linalg.block_diag(*([w] * a))               # [28A, A*H]
        return jnp.concatenate(
            [jnp.zeros((SELF_DIM, a * h), jnp.float32), blk], axis=0)

    wk_big = per_agent_block(wk * inv_sqrt_h)                       # [D, A*H]
    wv_big = per_agent_block(wv)                                    # [D, A*H]

    # constant 0/1 helpers: per-agent lane-block reduce / broadcast / gather.
    rdc = np.kron(np.eye(a, dtype=np.float32),
                  np.ones((h, 1), np.float32))                      # [A*H, A]
    bcast = np.kron(np.eye(a, dtype=np.float32),
                    np.ones((1, h), np.float32))                    # [A, A*H]
    gth = np.tile(np.eye(h, dtype=np.float32), (a, 1))              # [A*H, H]

    wo_att = wo[:h]                                                 # [H, O]
    wo_q = wo[h:]                                                   # [H, O]
    bo2d = bo.reshape(1, output_dim)                                # [1, O]

    return (wq_rep, wk_big, wv_big,
            jnp.asarray(rdc), jnp.asarray(bcast), jnp.asarray(gth),
            wo_att, wo_q, bo2d)


def _pick_batch_tile(b):
    for tb in (1024, 512, 256, 128, 64, 32, 16, 8):
        if b % tb == 0:
            return tb
    return b  # single block (block shape == full array, always legal)


def dot_scale_att_net(x, params, *, agent_num, hidden_dim, output_dim):
    b, d = x.shape
    assert d == SELF_DIM + AGENT_DIM * agent_num
    weights = _structured_weights(params, agent_num=agent_num,
                                  hidden_dim=hidden_dim,
                                  output_dim=output_dim)

    tb = _pick_batch_tile(b)
    grid = (b // tb,)

    def row_spec(cols):
        return pl.BlockSpec((tb, cols), lambda i: (i, 0))

    def resident_spec(arr):
        # constant block index -> weight stays resident in VMEM across steps
        return pl.BlockSpec(arr.shape, lambda i: (0, 0))

    in_specs = [row_spec(d)] + [resident_spec(w) for w in weights]
    out_specs = (row_spec(output_dim), row_spec(agent_num))

    out, att = pl.pallas_call(
        _dot_scale_att_kernel,
        out_shape=(jax.ShapeDtypeStruct((b, output_dim), jnp.float32),
                   jax.ShapeDtypeStruct((b, agent_num), jnp.float32)),
        grid=grid,
        in_specs=in_specs,
        out_specs=out_specs,
        compiler_params=pltpu.CompilerParams(
            dimension_semantics=("parallel",)),
    )(x, *weights)

    return out, att.reshape(b, 1, agent_num)


def _reference(x, params, *, agent_num, hidden_dim, output_dim):
    b = x.shape[0]
    self_info = x[:, :SELF_DIM]
    agents = (x[:, SELF_DIM:].reshape(b, agent_num, AGENT_DIM)
              .transpose(1, 0, 2))                                  # [A, B, 28]
    q = self_info @ params["wq"]
    keys = jnp.einsum("abi,ih->abh", agents, params["wk"])
    vals = jnp.einsum("abi,ih->abh", agents, params["wv"])
    scores = jnp.einsum("bh,abh->ba", q, keys) / jnp.sqrt(float(hidden_dim))
    att = jax.nn.softmax(scores, axis=-1)
    att_out = jnp.einsum("ba,abh->bh", att, vals)
    emb = jnp.concatenate([att_out, q], axis=1)
    out = emb @ params["wo"] + params["bo"]
    return out, att.reshape(b, 1, agent_num)


def init_params(key, hidden_dim, output_dim):
    k1, k2, k3, k4, k5 = jax.random.split(key, 5)
    scale = 0.1
    return {
        "wq": scale * jax.random.normal(k1, (SELF_DIM, hidden_dim), jnp.float32),
        "wk": scale * jax.random.normal(k2, (AGENT_DIM, hidden_dim), jnp.float32),
        "wv": scale * jax.random.normal(k3, (AGENT_DIM, hidden_dim), jnp.float32),
        "wo": scale * jax.random.normal(k4, (2 * hidden_dim, output_dim), jnp.float32),
        "bo": scale * jax.random.normal(k5, (output_dim,), jnp.float32),
    }


if __name__ == "__main__":
    batch = 4
    hidden_dim = 32
    output_dim = 8
    agent_num = 3
    obs_dim = SELF_DIM + AGENT_DIM * agent_num   # 120

    key = jax.random.PRNGKey(0)
    kx, kp = jax.random.split(key)
    x = jax.random.normal(kx, (batch, obs_dim), jnp.float32)
    params = init_params(kp, hidden_dim, output_dim)

    out, att = dot_scale_att_net(x, params, agent_num=agent_num,
                                 hidden_dim=hidden_dim, output_dim=output_dim)
    out = jax.block_until_ready(out)
    att = jax.block_until_ready(att)

    ref_out, ref_att = _reference(x, params, agent_num=agent_num,
                                  hidden_dim=hidden_dim, output_dim=output_dim)
    np.testing.assert_allclose(np.asarray(out), np.asarray(ref_out),
                               rtol=1e-2, atol=1e-2)
    np.testing.assert_allclose(np.asarray(att), np.asarray(ref_att),
                               rtol=1e-2, atol=1e-2)

    assert out.shape == (batch, output_dim)
    assert att.shape == (batch, 1, agent_num)
    print("KERNEL_OK")
</pallas_src>

<mosaic_0001>
module attributes {stable_mosaic.version = 11 : i64} {
  func.func @_dot_scale_att_kernel(%arg0: i32, %arg1: memref<4x120xf32, #tpu.memory_space<vmem>>, %arg2: memref<120x96xf32, #tpu.memory_space<vmem>>, %arg3: memref<120x96xf32, #tpu.memory_space<vmem>>, %arg4: memref<120x96xf32, #tpu.memory_space<vmem>>, %arg5: memref<96x3xf32, #tpu.memory_space<vmem>>, %arg6: memref<3x96xf32, #tpu.memory_space<vmem>>, %arg7: memref<96x32xf32, #tpu.memory_space<vmem>>, %arg8: memref<32x8xf32, #tpu.memory_space<vmem>>, %arg9: memref<32x8xf32, #tpu.memory_space<vmem>>, %arg10: memref<1x8xf32, #tpu.memory_space<vmem>>, %arg11: memref<4x8xf32, #tpu.memory_space<vmem>>, %arg12: memref<4x3xf32, #tpu.memory_space<vmem>>) attributes {dimension_semantics = [#tpu.dimension_semantics<parallel>], iteration_bounds = array<i64: 1>, scalar_prefetch = 0 : i64, scratch_operands = 0 : i64, tpu.core_type = #tpu.core_type<tc>, window_params = [{transform_indices = @transform_0, window_bounds = array<i64: 4, 120>}, {pipeline_mode = #tpu.pipeline_mode<synchronous>, transform_indices = @transform_1, window_bounds = array<i64: 120, 96>}, {pipeline_mode = #tpu.pipeline_mode<synchronous>, transform_indices = @transform_2, window_bounds = array<i64: 120, 96>}, {pipeline_mode = #tpu.pipeline_mode<synchronous>, transform_indices = @transform_3, window_bounds = array<i64: 120, 96>}, {pipeline_mode = #tpu.pipeline_mode<synchronous>, transform_indices = @transform_4, window_bounds = array<i64: 96, 3>}, {pipeline_mode = #tpu.pipeline_mode<synchronous>, transform_indices = @transform_5, window_bounds = array<i64: 3, 96>}, {pipeline_mode = #tpu.pipeline_mode<synchronous>, transform_indices = @transform_6, window_bounds = array<i64: 96, 32>}, {pipeline_mode = #tpu.pipeline_mode<synchronous>, transform_indices = @transform_7, window_bounds = array<i64: 32, 8>}, {pipeline_mode = #tpu.pipeline_mode<synchronous>, transform_indices = @transform_8, window_bounds = array<i64: 32, 8>}, {pipeline_mode = #tpu.pipeline_mode<synchronous>, transform_indices = @transform_9, window_bounds = array<i64: 1, 8>}, {transform_indices = @transform_10, window_bounds = array<i64: 4, 8>}, {transform_indices = @transform_11, window_bounds = array<i64: 4, 3>}]} {
    %c0 = arith.constant 0 : index
    %c0_0 = arith.constant 0 : index
    %0 = vector.load %arg1[%c0, %c0_0] : memref<4x120xf32, #tpu.memory_space<vmem>>, vector<4x120xf32>
    %c0_1 = arith.constant 0 : index
    %c0_2 = arith.constant 0 : index
    %1 = vector.load %arg2[%c0_1, %c0_2] : memref<120x96xf32, #tpu.memory_space<vmem>>, vector<120x96xf32>
    %cst = arith.constant dense<0.000000e+00> : vector<4x96xf32>
    %2 = tpu.matmul %0, %1, %cst {dimension_numbers = #tpu.dot_dimension_numbers<[1], [0], [0], [1], [0, 0, 1, 1], [], []>} : vector<4x120xf32>, vector<120x96xf32>, vector<4x96xf32> -> vector<4x96xf32>
    %c0_3 = arith.constant 0 : index
    %c0_4 = arith.constant 0 : index
    %3 = vector.load %arg3[%c0_3, %c0_4] : memref<120x96xf32, #tpu.memory_space<vmem>>, vector<120x96xf32>
    %cst_5 = arith.constant dense<0.000000e+00> : vector<4x96xf32>
    %4 = tpu.matmul %0, %3, %cst_5 {dimension_numbers = #tpu.dot_dimension_numbers<[1], [0], [0], [1], [0, 0, 1, 1], [], []>} : vector<4x120xf32>, vector<120x96xf32>, vector<4x96xf32> -> vector<4x96xf32>
    %c0_6 = arith.constant 0 : index
    %c0_7 = arith.constant 0 : index
    %5 = vector.load %arg4[%c0_6, %c0_7] : memref<120x96xf32, #tpu.memory_space<vmem>>, vector<120x96xf32>
    %cst_8 = arith.constant dense<0.000000e+00> : vector<4x96xf32>
    %6 = tpu.matmul %0, %5, %cst_8 {dimension_numbers = #tpu.dot_dimension_numbers<[1], [0], [0], [1], [0, 0, 1, 1], [], []>} : vector<4x120xf32>, vector<120x96xf32>, vector<4x96xf32> -> vector<4x96xf32>
    %7 = arith.mulf %2, %4 : vector<4x96xf32>
    %c0_9 = arith.constant 0 : index
    %c0_10 = arith.constant 0 : index
    %8 = vector.load %arg5[%c0_9, %c0_10] : memref<96x3xf32, #tpu.memory_space<vmem>>, vector<96x3xf32>
    %cst_11 = arith.constant dense<0.000000e+00> : vector<4x3xf32>
    %9 = tpu.matmul %7, %8, %cst_11 {dimension_numbers = #tpu.dot_dimension_numbers<[1], [0], [0], [1], [0, 0, 1, 1], [], []>} : vector<4x96xf32>, vector<96x3xf32>, vector<4x3xf32> -> vector<4x3xf32>
    %cst_12 = arith.constant dense<0xFF800000> : vector<4xf32>
    %10 = vector.multi_reduction <maximumf>, %9, %cst_12 [1] : vector<4x3xf32> to vector<4xf32>
    %11 = vector.shape_cast %10 : vector<4xf32> to vector<4x1xf32>
    %12 = vector.broadcast %11 : vector<4x1xf32> to vector<4x3xf32>
    %13 = arith.subf %9, %12 : vector<4x3xf32>
    %14 = math.exp %13 : vector<4x3xf32>
    %cst_13 = arith.constant dense<0.000000e+00> : vector<4xf32>
    %15 = vector.multi_reduction <add>, %14, %cst_13 [1] : vector<4x3xf32> to vector<4xf32>
    %16 = vector.shape_cast %15 : vector<4xf32> to vector<4x1xf32>
    %17 = vector.broadcast %16 : vector<4x1xf32> to vector<4x3xf32>
    %18 = arith.divf %14, %17 : vector<4x3xf32>
    %c0_14 = arith.constant 0 : index
    %c0_15 = arith.constant 0 : index
    %19 = vector.load %arg12[%c0_14, %c0_15] : memref<4x3xf32, #tpu.memory_space<vmem>>, vector<4x3xf32>
    tpu.vector_store %arg12[%c0_14, %c0_15], %18 {strides = array<i32>} : memref<4x3xf32, #tpu.memory_space<vmem>>, vector<4x3xf32>,
    %c0_16 = arith.constant 0 : index
    %c0_17 = arith.constant 0 : index
    %20 = vector.load %arg6[%c0_16, %c0_17] : memref<3x96xf32, #tpu.memory_space<vmem>>, vector<3x96xf32>
    %cst_18 = arith.constant dense<0.000000e+00> : vector<4x96xf32>
    %21 = tpu.matmul %18, %20, %cst_18 {dimension_numbers = #tpu.dot_dimension_numbers<[1], [0], [0], [1], [0, 0, 1, 1], [], []>} : vector<4x3xf32>, vector<3x96xf32>, vector<4x96xf32> -> vector<4x96xf32>
    %22 = arith.mulf %21, %6 : vector<4x96xf32>
    %c0_19 = arith.constant 0 : index
    %c0_20 = arith.constant 0 : index
    %23 = vector.load %arg7[%c0_19, %c0_20] : memref<96x32xf32, #tpu.memory_space<vmem>>, vector<96x32xf32>
    %cst_21 = arith.constant dense<0.000000e+00> : vector<4x32xf32>
    %24 = tpu.matmul %22, %23, %cst_21 {dimension_numbers = #tpu.dot_dimension_numbers<[1], [0], [0], [1], [0, 0, 1, 1], [], []>} : vector<4x96xf32>, vector<96x32xf32>, vector<4x32xf32> -> vector<4x32xf32>
    %25 = vector.extract_strided_slice %2 {offsets = [0, 0], sizes = [4, 32], strides = [1, 1]} : vector<4x96xf32> to vector<4x32xf32>
    %c0_22 = arith.constant 0 : index
    %c0_23 = arith.constant 0 : index
    %26 = vector.load %arg8[%c0_22, %c0_23] : memref<32x8xf32, #tpu.memory_space<vmem>>, vector<32x8xf32>
    %cst_24 = arith.constant dense<0.000000e+00> : vector<4x8xf32>
    %27 = tpu.matmul %24, %26, %cst_24 {dimension_numbers = #tpu.dot_dimension_numbers<[1], [0], [0], [1], [0, 0, 1, 1], [], []>} : vector<4x32xf32>, vector<32x8xf32>, vector<4x8xf32> -> vector<4x8xf32>
    %c0_25 = arith.constant 0 : index
    %c0_26 = arith.constant 0 : index
    %28 = vector.load %arg9[%c0_25, %c0_26] : memref<32x8xf32, #tpu.memory_space<vmem>>, vector<32x8xf32>
    %cst_27 = arith.constant dense<0.000000e+00> : vector<4x8xf32>
    %29 = tpu.matmul %25, %28, %cst_27 {dimension_numbers = #tpu.dot_dimension_numbers<[1], [0], [0], [1], [0, 0, 1, 1], [], []>} : vector<4x32xf32>, vector<32x8xf32>, vector<4x8xf32> -> vector<4x8xf32>
    %30 = arith.addf %27, %29 : vector<4x8xf32>
    %c0_28 = arith.constant 0 : index
    %c0_29 = arith.constant 0 : index
    %31 = vector.load %arg10[%c0_28, %c0_29] : memref<1x8xf32, #tpu.memory_space<vmem>>, vector<1x8xf32>
    %32 = vector.broadcast %31 : vector<1x8xf32> to vector<4x8xf32>
    %33 = arith.addf %30, %32 : vector<4x8xf32>
    %c0_30 = arith.constant 0 : index
    %c0_31 = arith.constant 0 : index
    %34 = vector.load %arg11[%c0_30, %c0_31] : memref<4x8xf32, #tpu.memory_space<vmem>>, vector<4x8xf32>
    tpu.vector_store %arg11[%c0_30, %c0_31], %33 {strides = array<i32>} : memref<4x8xf32, #tpu.memory_space<vmem>>, vector<4x8xf32>,
    return
  }
  func.func @transform_0(%arg0: i32) -> (i32, i32) {
    %c0_i32 = arith.constant 0 : i32
    %c0_i32_0 = arith.constant 0 : i32
    return %arg0, %c0_i32 : i32, i32
  }
  func.func @transform_1(%arg0: i32) -> (i32, i32) {
    %c0_i32 = arith.constant 0 : i32
    %c0_i32_0 = arith.constant 0 : i32
    %c0_i32_1 = arith.constant 0 : i32
    return %c0_i32, %c0_i32_0 : i32, i32
  }
  func.func @transform_2(%arg0: i32) -> (i32, i32) {
    %c0_i32 = arith.constant 0 : i32
    %c0_i32_0 = arith.constant 0 : i32
    %c0_i32_1 = arith.constant 0 : i32
    return %c0_i32, %c0_i32_0 : i32, i32
  }
  func.func @transform_3(%arg0: i32) -> (i32, i32) {
    %c0_i32 = arith.constant 0 : i32
    %c0_i32_0 = arith.constant 0 : i32
    %c0_i32_1 = arith.constant 0 : i32
    return %c0_i32, %c0_i32_0 : i32, i32
  }
  func.func @transform_4(%arg0: i32) -> (i32, i32) {
    %c0_i32 = arith.constant 0 : i32
    %c0_i32_0 = arith.constant 0 : i32
    %c0_i32_1 = arith.constant 0 : i32
    return %c0_i32, %c0_i32_0 : i32, i32
  }
  func.func @transform_5(%arg0: i32) -> (i32, i32) {
    %c0_i32 = arith.constant 0 : i32
    %c0_i32_0 = arith.constant 0 : i32
    %c0_i32_1 = arith.constant 0 : i32
    return %c0_i32, %c0_i32_0 : i32, i32
  }
  func.func @transform_6(%arg0: i32) -> (i32, i32) {
    %c0_i32 = arith.constant 0 : i32
    %c0_i32_0 = arith.constant 0 : i32
    %c0_i32_1 = arith.constant 0 : i32
    return %c0_i32, %c0_i32_0 : i32, i32
  }
  func.func @transform_7(%arg0: i32) -> (i32, i32) {
    %c0_i32 = arith.constant 0 : i32
    %c0_i32_0 = arith.constant 0 : i32
    %c0_i32_1 = arith.constant 0 : i32
    return %c0_i32, %c0_i32_0 : i32, i32
  }
  func.func @transform_8(%arg0: i32) -> (i32, i32) {
    %c0_i32 = arith.constant 0 : i32
    %c0_i32_0 = arith.constant 0 : i32
    %c0_i32_1 = arith.constant 0 : i32
    return %c0_i32, %c0_i32_0 : i32, i32
  }
  func.func @transform_9(%arg0: i32) -> (i32, i32) {
    %c0_i32 = arith.constant 0 : i32
    %c0_i32_0 = arith.constant 0 : i32
    %c0_i32_1 = arith.constant 0 : i32
    return %c0_i32, %c0_i32_0 : i32, i32
  }
  func.func @transform_10(%arg0: i32) -> (i32, i32) {
    %c0_i32 = arith.constant 0 : i32
    %c0_i32_0 = arith.constant 0 : i32
    return %arg0, %c0_i32 : i32, i32
  }
  func.func @transform_11(%arg0: i32) -> (i32, i32) {
    %c0_i32 = arith.constant 0 : i32
    %c0_i32_0 = arith.constant 0 : i32
    return %arg0, %c0_i32 : i32, i32
  }
}

</mosaic_0001>

<bundles_post_ra>
// kernel: tpu_custom_call.1
= control target key start
LH: loop header
LB: loop body
LE: loop exit
PB: predicated region body
PF: predicated region fallthrough
CT: control target
= control target key end

     0   :  { %17 = vsyncpa [#allocation3], 0  ;;  %s766_s0 = inlined_call_operand.vmem [shape: f32[4,120], index: 0, kind: input, shape index: {}]   ;;  %s767_s1 = inlined_call_operand.vmem [shape: f32[120,96], index: 1, kind: input, shape index: {}]   ;;  %s768_s2 = inlined_call_operand.vmem [shape: f32[120,96], index: 2, kind: input, shape index: {}]   ;;  %s769_s3 = inlined_call_operand.vmem [shape: f32[120,96], index: 3, kind: input, shape index: {}]   ;;  %s770_s4 = inlined_call_operand.vmem [shape: f32[96,3], index: 4, kind: input, shape index: {}]   ;;  %s771_s5 = inlined_call_operand.vmem [shape: f32[3,96], index: 5, kind: input, shape index: {}]   ;;  %s772_s6 = inlined_call_operand.vmem [shape: f32[96,32], index: 6, kind: input, shape index: {}]   ;;  %s773_s7 = inlined_call_operand.vmem [shape: f32[32,8], index: 7, kind: input, shape index: {}]   ;;  %s774_s8 = inlined_call_operand.vmem [shape: f32[32,8], index: 8, kind: input, shape index: {}]   ;;  %s775_s9 = inlined_call_operand.vmem [shape: f32[1,8], index: 9, kind: input, shape index: {}]   ;;  %s776_s10 = inlined_call_operand.hbm [shape: f32[4,8], index: 10, kind: output, shape index: {0}]   ;;  %s777_s11 = inlined_call_operand.hbm [shape: f32[4,3], index: 11, kind: output, shape index: {1}]  }
   0x1   :  { %v54_v0 = vld [vmem:[%s767_s1 + $0x70] sm:$0xff]  ;;  %v53_v2 = vld [vmem:[%s767_s1 + $0x68] sm:$0xff]  ;;  %v52_v4 = vld [vmem:[%s767_s1 + $0x60] sm:$0xff] }
   0x2   :  { %v93_v1 = vld [vmem:[%s768_s2 + $0x70] sm:$0xff]  ;;  %60 = vmatpush.msra.mxu0 %v54_v0  ;;  %v92_v3 = vld [vmem:[%s768_s2 + $0x68] sm:$0xff]  ;;  %v91_v5 = vld [vmem:[%s768_s2 + $0x60] sm:$0xff] }
   0x3   :  { %95 = vmatpush.msra.mxu1 %v93_v1  ;;  %v51_v6 = vld [vmem:[%s767_s1 + $0x58] sm:$0xff]  ;;  %v50_v8 = vld [vmem:[%s767_s1 + $0x50] sm:$0xff]  ;;  %v49_v10 = vld [vmem:[%s767_s1 + $0x48] sm:$0xff] }
   0x4   :  { %61 = vmatpush.msra.mxu0 %v53_v2  ;;  %v90_v7 = vld [vmem:[%s768_s2 + $0x58] sm:$0xff]  ;;  %v89_v9 = vld [vmem:[%s768_s2 + $0x50] sm:$0xff]  ;;  %v88_v11 = vld [vmem:[%s768_s2 + $0x48] sm:$0xff] }
   0x5   :  { %96 = vmatpush.msra.mxu1 %v92_v3  ;;  %v48_v12 = vld [vmem:[%s767_s1 + $0x40] sm:$0xff]  ;;  %v161_v14 = vld [vmem:[%s770_s4 + $0x58] sm:$0xff]  ;;  %v160_v15 = vld [vmem:[%s770_s4 + $0x50] sm:$0xff] }
   0x6   :  { %62 = vmatpush.msra.mxu0 %v52_v4  ;;  %v87_v13 = vld [vmem:[%s768_s2 + $0x40] sm:$0xff]  ;;  %v47_v16 = vld [vmem:[%s767_s1 + $0x38] sm:$0xff]  ;;  %170 = vmatpush.msra.mxu3 %v161_v14  ;;  %v159_v18 = vld [vmem:[%s770_s4 + $0x48] sm:$0xff] }
   0x7   :  { %97 = vmatpush.msra.mxu1 %v91_v5  ;;  %v86_v17 = vld [vmem:[%s768_s2 + $0x38] sm:$0xff]  ;;  %v46_v19 = vld [vmem:[%s767_s1 + $0x30] sm:$0xff]  ;;  %v158_v21 = vld [vmem:[%s770_s4 + $0x40] sm:$0xff] }
   0x8   :  { %63 = vmatpush.msra.mxu0 %v51_v6  ;;  %v85_v20 = vld [vmem:[%s768_s2 + $0x30] sm:$0xff]  ;;  %171 = vmatpush.msra.mxu3 %v160_v15 }
   0x9   :  { %98 = vmatpush.msra.mxu1 %v90_v7 }
   0xa   :  { %64 = vmatpush.msra.mxu0 %v50_v8 }
   0xb   :  { %99 = vmatpush.msra.mxu1 %v89_v9 }
   0xc   :  { %65 = vmatpush.msra.mxu0 %v49_v10 }
   0xd   :  { %100 = vmatpush.msra.mxu1 %v88_v11 }
   0xe   :  { %66 = vmatpush.msra.mxu0 %v48_v12 }
   0xf   :  { %101 = vmatpush.msra.mxu1 %v87_v13 }
  0x10   :  { %67 = vmatpush.msra.mxu0 %v47_v16 }
  0x11   :  { %102 = vmatpush.msra.mxu1 %v86_v17 }
  0x12   :  { %18 = vsyncpa [#allocation5], 0  ;;  %v45_v22 = vld [vmem:[%s767_s1 + $0x28] sm:$0xff]  ;;  %172 = vmatpush.msra.mxu3 %v159_v18  ;;  %68 = vmatpush.msra.mxu0 %v46_v19  ;;  %v157_v24 = vld [vmem:[%s770_s4 + $0x38] sm:$0xff]  ;;  %vm55_vm0 = vcmask 982016   ;;  %vm285_vm1 = vcmask 261120  }
  0x13   :  { %v84_v23 = vld [vmem:[%s768_s2 + $0x28] sm:$0xff]  ;;  %103 = vmatpush.msra.mxu1 %v85_v20  ;;  %v44_v25 = vld [vmem:[%s767_s1 + $0x20] sm:$0xff]  ;;  %v156_v27 = vld [vmem:[%s770_s4 + $0x30] sm:$0xff]  ;;  %vm162_vm2 = vcmask 785408   ;;  %vm186_vm3 = vcmask 19456   ;;  %vm217_vm4 = vcmask 1042432  }
  0x14   :  { %v83_v26 = vld [vmem:[%s768_s2 + $0x20] sm:$0xff]  ;;  %173 = vmatpush.msra.mxu3 %v158_v21  ;;  %69 = vmatpush.msra.mxu0 %v45_v22  ;;  %v43_v28 = vld [vmem:[%s767_s1 + $0x18] sm:$0xff]  ;;  %v155_v30 = vld [vmem:[%s770_s4 + $0x28] sm:$0xff]  ;;  %vm213_vm9 = vcmask 23552   ;;  %s440_s25 = smov [#allocation2]   ;;  %s346_s29 = sshll.u32 %s776_s10, 4  ;;  %s347_s29 = int_to_ptr.hbm [resolvable:$true] %s346_s29 }
  0x15   :  { %104 = vmatpush.msra.mxu1 %v84_v23  ;;  %v82_v29 = vld [vmem:[%s768_s2 + $0x18] sm:$0xff]  ;;  %v42_v31 = vld [vmem:[%s767_s1 + $0x10] sm:$0xff]  ;;  %v154_v33 = vld [vmem:[%s770_s4 + $0x20] sm:$0xff]  ;;  %s344_s26 = sshll.u32 %s440_s25, 4  ;;  %vm337_vm10 = vcmask 60416   ;;  %s345_s26 = int_to_ptr.vmem [resolvable:$true] %s344_s26 }
  0x16   :  { %174 = vmatpush.msra.mxu3 %v157_v24  ;;  %70 = vmatpush.msra.mxu0 %v44_v25  ;;  %v81_v32 = vld [vmem:[%s768_s2 + $0x10] sm:$0xff]  ;;  %v41_v34 = vld [vmem:[%s767_s1 + $0x8] sm:$0xff]  ;;  %v153_v36 = vld [vmem:[%s770_s4 + $0x18] sm:$0xff] }
  0x17   :  { %105 = vmatpush.msra.mxu1 %v83_v26  ;;  %v80_v35 = vld [vmem:[%s768_s2 + $0x8] sm:$0xff]  ;;  %v40_v37 = vld [vmem:[%s767_s1] sm:$0xff]  ;;  %v284_v40 = vld [vmem:[%s774_s8 + $0x18] sm:$0xff] }
  0x18   :  { %175 = vmatpush.msra.mxu3 %v156_v27  ;;  %71 = vmatpush.msra.mxu0 %v43_v28  ;;  %v79_v38 = vld [vmem:[%s768_s2] sm:$0xff]  ;;  %v152_v41 = vld [vmem:[%s770_s4 + $0x10] sm:$0xff]  ;;  %v282_v43 = vld [vmem:[%s774_s8 + $0x8] sm:$0xff]  ;;  %s357_s2 = sshll.u32 %s777_s11, 4  ;;  %s358_s2 = int_to_ptr.hbm [resolvable:$true] %s357_s2 }
  0x19   :  { %106 = vmatpush.msra.mxu1 %v82_v29  ;;  %v621_v39 = vld [vmem:[%s766_s0] sm:$0xf]  ;;  %v283_v42 = vld [vmem:[%s774_s8 + $0x10] sm:$0xff]  ;;  %v151_v44 = vld [vmem:[%s770_s4 + $0x8] sm:$0xff] }
  0x1a   :  { %176 = vmatpush.msra.mxu3 %v155_v30  ;;  %72 = vmatpush.msra.mxu0 %v42_v31  ;;  %v281_v45 = vld [vmem:[%s774_s8] sm:$0xff]  ;;  %v128_v52 = vld [vmem:[%s769_s3 + $0x70] sm:$0xff]  ;;  %v127_v53 = vld [vmem:[%s769_s3 + $0x68] sm:$0xff] }
  0x1b   :  { %107 = vmatpush.msra.mxu1 %v81_v32  ;;  %v150_v46 = vld [vmem:[%s770_s4] sm:$0xff]  ;;  %130 = vmatpush.msra.mxu2 %v128_v52  ;;  %v125_v55 = vld [vmem:[%s769_s3 + $0x58] sm:$0xff]  ;;  %v124_v56 = vld [vmem:[%s769_s3 + $0x50] sm:$0xff] }
  0x1c   :  { %177 = vmatpush.msra.mxu3 %v154_v33  ;;  %73 = vmatpush.msra.mxu0 %v41_v34  ;;  %v126_v54 = vld [vmem:[%s769_s3 + $0x60] sm:$0xff]  ;;  %v123_v62 = vld [vmem:[%s769_s3 + $0x48] sm:$0xff]  ;;  %v121_v0 = vld [vmem:[%s769_s3 + $0x38] sm:$0xff] }
  0x1d   :  { %108 = vmatpush.msra.mxu1 %v80_v35  ;;  %131 = vmatpush.msra.mxu2 %v127_v53  ;;  %v122_v63 = vld [vmem:[%s769_s3 + $0x40] sm:$0xff]  ;;  %v120_v1 = vld [vmem:[%s769_s3 + $0x30] sm:$0xff]  ;;  %v119_v2 = vld [vmem:[%s769_s3 + $0x28] sm:$0xff] }
  0x1e   :  { %178 = vmatpush.msra.mxu3 %v153_v36  ;;  %74 = vmatpush.msra.mxu0 %v40_v37  ;;  %v118_v3 = vld [vmem:[%s769_s3 + $0x20] sm:$0xff]  ;;  %v117_v4 = vld [vmem:[%s769_s3 + $0x18] sm:$0xff]  ;;  %v116_v5 = vld [vmem:[%s769_s3 + $0x10] sm:$0xff] }
  0x1f   :  { %109 = vmatpush.msra.mxu1 %v79_v38  ;;  %371 = vmatmul.msk.f32.vlgmr.msra.gmra.mxu0 %vm55_vm0, %v621_v39  ;;  %v212_v6 = vld [vmem:[%s771_s5] sm:$0x7]  ;;  %v115_v7 = vld [vmem:[%s769_s3 + $0x8] sm:$0xff]  ;;  %v253_v9 = vld [vmem:[%s772_s6 + $0x58] sm:$0xff] }
  0x20   :  { %372 = vmatmul.msk.f32.vlgmr.msra.gmra.mxu1 %vm55_vm0, %v621_v39  ;;  %179 = vmatpush.msra.mxu3 %v152_v41  ;;  %v114_v8 = vld [vmem:[%s769_s3] sm:$0xff]  ;;  %v252_v10 = vld [vmem:[%s772_s6 + $0x50] sm:$0xff]  ;;  %v251_v11 = vld [vmem:[%s772_s6 + $0x48] sm:$0xff] }
  0x21   :  { %301 = vmatpush.msrb.mxu1 %v284_v40  ;;  %132 = vmatpush.msra.mxu2 %v126_v54  ;;  %v250_v12 = vld [vmem:[%s772_s6 + $0x40] sm:$0xff]  ;;  %v249_v13 = vld [vmem:[%s772_s6 + $0x38] sm:$0xff]  ;;  %v248_v14 = vld [vmem:[%s772_s6 + $0x30] sm:$0xff] }
  0x22   :  { %180 = vmatpush.msra.mxu3 %v151_v44  ;;  %261 = vmatpush.msrb.mxu0 %v253_v9  ;;  %v247_v15 = vld [vmem:[%s772_s6 + $0x28] sm:$0xff]  ;;  %v246_v17 = vld [vmem:[%s772_s6 + $0x20] sm:$0xff]  ;;  %v245_v18 = vld [vmem:[%s772_s6 + $0x18] sm:$0xff] }
  0x23   :  { %302 = vmatpush.msrb.mxu1 %v283_v42  ;;  %133 = vmatpush.msra.mxu2 %v125_v55  ;;  %v244_v19 = vld [vmem:[%s772_s6 + $0x10] sm:$0xff]  ;;  %v243_v31 = vld [vmem:[%s772_s6 + $0x8] sm:$0xff]  ;;  %v242_v32 = vld [vmem:[%s772_s6] sm:$0xff]  ;;  %s439_s6 = smov [#allocation4]  }
  0x24   :  { %181 = vmatpush.msra.mxu3 %v150_v46  ;;  %262 = vmatpush.msrb.mxu0 %v252_v10  ;;  %v280_v33 = vld [vmem:[%s773_s7 + $0x18] sm:$0xff]  ;;  %v279_v34 = vld [vmem:[%s773_s7 + $0x10] sm:$0xff]  ;;  %v278_v35 = vld [vmem:[%s773_s7 + $0x8] sm:$0xff]  ;;  %s355_s3 = sshll.u32 %s439_s6, 4  ;;  %s356_s3 = int_to_ptr.vmem [resolvable:$true] %s355_s3 }
  0x25   :  { %303 = vmatpush.msrb.mxu1 %v282_v43  ;;  %134 = vmatpush.msra.mxu2 %v124_v56  ;;  %v277_v36 = vld [vmem:[%s773_s7] sm:$0xff] }
  0x26   :  { %375 = vmatpush.msk.msrb.mxu3 %vm217_vm4, %v212_v6  ;;  %263 = vmatpush.msrb.mxu0 %v251_v11  ;;  %v382_v41 = vld [vmem:[%s775_s9] ss:$0 sm:$0xff] }
  0x27   :  { %304 = vmatpush.msrb.mxu1 %v281_v45  ;;  %135 = vmatpush.msra.mxu2 %v123_v62 }
  0x28   :  { %264 = vmatpush.msrb.mxu0 %v250_v12 }
  0x29   :  { %136 = vmatpush.msra.mxu2 %v122_v63 }
  0x2a   :  { %265 = vmatpush.msrb.mxu0 %v249_v13 }
  0x2b   :  { %137 = vmatpush.msra.mxu2 %v121_v0 }
  0x2c   :  { %266 = vmatpush.msrb.mxu0 %v248_v14 }
  0x2d   :  { %138 = vmatpush.msra.mxu2 %v120_v1 }
  0x2e   :  { %267 = vmatpush.msrb.mxu0 %v247_v15 }
  0x2f   :  { %139 = vmatpush.msra.mxu2 %v119_v2 }
  0x30   :  { %268 = vmatpush.msrb.mxu0 %v246_v17 }
  0x31   :  { %140 = vmatpush.msra.mxu2 %v118_v3 }
  0x32   :  { %269 = vmatpush.msrb.mxu0 %v245_v18 }
  0x33   :  { %141 = vmatpush.msra.mxu2 %v117_v4 }
  0x34   :  { %270 = vmatpush.msrb.mxu0 %v244_v19 }
  0x35   :  { %142 = vmatpush.msra.mxu2 %v116_v5 }
  0x36   :  { %271 = vmatpush.msrb.mxu0 %v243_v31 }
  0x37   :  { %143 = vmatpush.msra.mxu2 %v115_v7 }
  0x38   :  { %272 = vmatpush.msrb.mxu0 %v242_v32 }
  0x39   :  { %144 = vmatpush.msra.mxu2 %v114_v8 }
  0x3a   :  { %373 = vmatmul.msk.f32.vlgmr.msra.gmra.mxu2 %vm55_vm0, %v621_v39 }
  0x3b   :  { %324 = vmatpush.msrb.mxu2 %v280_v33 }
  0x3d   :  { %325 = vmatpush.msrb.mxu2 %v279_v34 }
  0x3f   :  { %326 = vmatpush.msrb.mxu2 %v278_v35 }
  0x41   :  { %327 = vmatpush.msrb.mxu2 %v277_v36 }
  0x9c   :  { %v76_v47 = vpop.f32.mrf.mxu0 }
  0x9d   :  { %v111_v48 = vpop.f32.mrf.mxu1  ;;  %378 = vmatmul.msk.f32.vlgmr.msrb.gmra.mxu1 %vm285_vm1, %v76_v47 }
  0x9e   :  { %v149_v49 = vmul.f32 %v111_v48, %v76_v47 }
  0xa0   :  { %374 = vmatmul.msk.f32.vlgmr.msra.gmra.mxu3 %vm162_vm2, %v149_v49 }
  0xbd   :  { %v146_v37 = vpop.f32.mrf.mxu2 }
 0x11a   :  { %v306_v42 = vpop.f32.mrf.mxu1 }
 0x123   :  { %v183_v50 = vpop.f32.mrf.mxu3 }
 0x124   :  { %v187_v51 = vsel %vm186_vm3, %v183_v50, -inf }
 0x125   :  { %188 = vmax.xlane.f32.xlu0 %v187_v51 }
 0x198   :  { %v189_v57 = vpop.xlane.xlu0 %188 }
 0x199   :  { %v190_v58 = vsub.f32 %v183_v50, %v189_v57 }
 0x19b   :  { %v191_v59 = vmul.f32 1.442695, %v190_v58 }
 0x19d   :  { %383 = vpow2.f32 %v191_v59 }
 0x1a3   :  { %v666_v60 = vpop.eup %383 }
 0x1a4   :  { %v193_v61 = vsel %vm186_vm3, %v666_v60, 0.0 }
 0x1a5   :  { %194 = vadd.xlane.f32.xlu0 %v193_v61 }
 0x218   :  { %v195_v16 = vpop.xlane.xlu0 %194 }
 0x219   :  { %385 = vrcp.f32 %v195_v16  ;;  %v207_v23 = vand.u32 2147483648, %v195_v16  ;;  %v205_v25 = vand.u32 2147483647, %v195_v16  ;;  %vm201_vm6 = vweird.f32 %v195_v16 }
 0x21b   :  { %v208_v27 = vor.u32 1.1754944e-38, %v207_v23  ;;  %vm206_vm8 = vcmp.eq.f32.partialorder %v205_v25, 8.507059e+37 }
 0x21f   :  { %v386_v20 = vpop.eup %385 }
 0x220   :  { %v197_v21 = vmul.f32 %v386_v20, %v195_v16  ;;  %vm202_vm5 = vweird.f32 %v386_v20 }
 0x221   :  { %vm203_vm7 = vmor %vm201_vm6, %vm202_vm5 }
 0x222   :  { %v198_v22 = vsub.f32 1.0, %v197_v21 }
 0x224   :  { %v199_v24 = vmul.f32 %v386_v20, %v198_v22 }
 0x226   :  { %v200_v26 = vadd.f32 %v386_v20, %v199_v24 }
 0x228   :  { %v204_v28 = vsel %vm203_vm7, %v386_v20, %v200_v26 }
 0x229   :  { %v209_v29 = vsel %vm206_vm8, %v208_v27, %v204_v28 }
 0x22a   :  { %v210_v30 = vmul.f32 %v666_v60, %v209_v29 }
 0x22c   :  { %376 = vmatmul.msk.f32.vlgmr.msrb.gmra.mxu3 %vm213_vm9, %v210_v30  ;;  %211 = vst.msk [vmem:[#allocation4] sm:$0xf] %vm186_vm3, %v210_v30 }
 0x22d   :  { %360 = dma.vmem_to_hbm [thread:$0]  %s356_s3, 64, %s358_s2, [#allocation5]  }
 0x2af   :  { %v238_v38 = vpop.f32.mrf.mxu3 }
 0x2b0   :  { %v241_v39 = vmul.f32 %v238_v38, %v146_v37 }
 0x2b2   :  { %377 = vmatmul.msk.f32.vlgmr.msrb.gmra.mxu0 %vm162_vm2, %v241_v39 }
 0x32f   :  { %v274_v40 = vpop.f32.mrf.mxu0 }
 0x330   :  { %379 = vmatmul.msk.f32.vlgmr.msrb.gmra.mxu2 %vm285_vm1, %v274_v40 }
 0x3b3   :  { %v329_v43 = vpop.f32.mrf.mxu2 }
 0x3b4   :  { %v330_v44 = vadd.f32 %v329_v43, %v306_v42 }
 0x3b6   :  { %v336_v45 = vadd.f32 %v382_v41, %v330_v44 }
 0x3b8   :  { %338 = vst.msk [vmem:[#allocation2] sm:$0xf] %vm337_vm10, %v336_v45 }
 0x3b9   :  { %349 = dma.vmem_to_hbm [thread:$0]  %s345_s26, 64, %s347_s29, [#allocation3]  }
 0x3ba   :  { %435 = dma.done.wait [#allocation3], 64  }
 0x3bb   :  { %436 = vsyncadd [#allocation3], 4294967232 }
 0x3bc   :  { %437 = dma.done.wait [#allocation5], 64  }
 0x3bd   :  { %438 = vsyncadd [#allocation5], 4294967232 }
 0x3be   :  { %369 = vsyncpa [#allocation3], 1 }
 0x3bf   :  { %370 = vsyncpa [#allocation5], 1 }

</bundles_post_ra>
